<compile_context>
chip_gen: v7x
topology: tpu7x:2x2x1
jax: 0.10.0
libtpu: 0.0.40
codegen_flags: <defaults>
</compile_context>

<pallas_src>
import functools

import jax
import jax.numpy as jnp
from jax.experimental import pallas as pl
from jax.experimental.pallas import tpu as pltpu


def _lora_kernel(x_ref, a_ref, b_ref, o_ref):
    # x_ref: (tm, dim) row tile; a_ref: (dim, r_pad); b_ref: (r_pad, dim).
    # Both matmuls accumulate in f32 on the MXU; the rank-r intermediate is fed
    # to the second matmul at the weight dtype (MXU native width on the bf16
    # path -- one extra rounding vs. a pure-f32 chain).
    h = jnp.dot(x_ref[...], a_ref[...], preferred_element_type=jnp.float32)
    h = h.astype(b_ref.dtype)
    y = jnp.dot(h, b_ref[...], preferred_element_type=jnp.float32)
    o_ref[...] = y.astype(o_ref.dtype)


@functools.lru_cache(maxsize=None)
def _vmem_capacity_bytes():
    try:
        cap = int(getattr(pltpu.get_tpu_info(), "vmem_capacity_bytes", 0))
        if cap > 0:
            return cap
    except Exception:
        pass
    return 64 << 20  # conservative fallback: v7x per-TensorCore VMEM


@functools.lru_cache(maxsize=None)
def _num_tensorcores():
    try:
        info = pltpu.get_tpu_info()
        for attr in ("num_cores", "core_count", "tensorcore_count", "num_tensorcores"):
            v = getattr(info, attr, None)
            if isinstance(v, int) and v > 0:
                return v
    except Exception:
        pass
    try:
        kind = jax.devices()[0].device_kind.lower()
        if "7" in kind:  # v7x: 2 TensorCores per chip
            return 2
    except Exception:
        pass
    return 1  # v5e / v6e: one TensorCore per chip


def _choose_tm(m, dim, itemsize, tm_request, num_tc, stream_budget):
    """Row tile: large (amortize ~0.35us/step, saturate HBM), sublane-aligned,
    VMEM-safe, split across TensorCores only when the chip has more than one."""
    sub = max(8, 32 // itemsize)                 # 8 (f32), 16 (bf16), 32 (int8)
    r_up = lambda v: -(-v // sub) * sub
    if tm_request is None:
        target_step_bytes = 8 << 20              # x in + y out per grid step
        tm = target_step_bytes // (2 * dim * itemsize)
    else:
        tm = int(tm_request)
    tm = max(sub, (tm // sub) * sub)
    # Double-buffered x + y tiles must fit the streaming budget.
    tm = min(tm, max(sub, (stream_budget // (4 * dim * itemsize)) // sub * sub))
    # Megacore chips only: keep >= 2 grid steps per TensorCore when M allows.
    # On single-core chips splitting small M only adds per-step overhead.
    if num_tc > 1 and m > 2 * num_tc * sub:
        tm = min(tm, r_up(pl.cdiv(m, 2 * num_tc)))
    tm = min(tm, r_up(m))                        # never bigger than the data
    return max(sub, tm)


@functools.partial(jax.jit, static_argnames=("tm",))
def lora_adapter_forward(x, a_t, b_t, *, tm=None):
    """x: (..., dim); a_t = A.T: (dim, r); b_t = B.T: (r, dim) where
    A = Linear(dim, r).weight and B = Linear(r, dim).weight.
    Returns Sequential(Linear(dim, r), Linear(r, dim))(x), shape (..., dim)."""
    orig_shape = x.shape
    dim = orig_shape[-1]
    r = a_t.shape[1]
    x2 = x.reshape(-1, dim)
    m = x2.shape[0]
    itemsize = jnp.dtype(x.dtype).itemsize

    # Zero-pad the rank axis up to the sublane quantum (exact: extra columns of
    # A.T / rows of B.T are zero) so the (tm, r) intermediate and the (r, dim)
    # weight are layout-friendly. Weights stay KB-scale.
    sub = max(8, 32 // itemsize)
    r_pad = -(-r // sub) * sub
    a2 = a_t.astype(x.dtype)
    b2 = b_t.astype(x.dtype)
    if r_pad != r:
        a2 = jnp.pad(a2, ((0, 0), (0, r_pad - r)))
        b2 = jnp.pad(b2, ((0, r_pad - r), (0, 0)))

    vmem_cap = _vmem_capacity_bytes()
    num_tc = _num_tensorcores()
    stream_budget = max(16 << 20, min(vmem_cap - (24 << 20), 96 << 20))
    tile_m = _choose_tm(m, dim, itemsize, tm, num_tc, stream_budget)

    # Explicit VMEM sizing: double-buffered x + y tiles, resident weights,
    # headroom for Mosaic internal scratch; capped below physical capacity.
    stream_bytes = 2 * 2 * tile_m * dim * itemsize
    weight_bytes = 2 * 2 * dim * r_pad * itemsize
    vmem_limit = int(min(vmem_cap - (16 << 20),
                         max(32 << 20, stream_bytes + weight_bytes + (8 << 20))))

    grid = (pl.cdiv(m, tile_m),)  # partial final block handled/masked by Pallas
    cost = pl.CostEstimate(
        flops=4 * m * dim * r_pad,
        transcendentals=0,
        bytes_accessed=2 * m * dim * itemsize + 2 * dim * r_pad * itemsize,
    )

    out = pl.pallas_call(
        _lora_kernel,
        out_shape=jax.ShapeDtypeStruct((m, dim), x.dtype),
        grid_spec=pltpu.PrefetchScalarGridSpec(
            num_scalar_prefetch=0,
            grid=grid,
            in_specs=[pl.BlockSpec((tile_m, dim), lambda i: (i, 0)),
                      pl.BlockSpec((dim, r_pad), lambda i: (0, 0)),   # A.T resident
                      pl.BlockSpec((r_pad, dim), lambda i: (0, 0))],  # B.T resident
            out_specs=pl.BlockSpec((tile_m, dim), lambda i: (i, 0))),
        compiler_params=pltpu.CompilerParams(
            dimension_semantics=("parallel",),
            vmem_limit_bytes=vmem_limit),
        cost_estimate=cost,
    )(x2, a2, b2)

    return out.reshape(orig_shape)


def make_lora_params(key, dim=256, r=4):
    """Parameters matching LoRA_Adapter.init_weights():
    Linear(dim, r).weight ~ normal(0, 1); Linear(r, dim).weight = 0."""
    params = {}
    for i, w_type in enumerate(("q", "k", "v", "o")):
        k1 = jax.random.fold_in(key, i)
        A = jax.random.normal(k1, (r, dim), dtype=jnp.float32)  # Linear(dim, r).weight
        B = jnp.zeros((dim, r), dtype=jnp.float32)              # Linear(r, dim).weight (zero init)
        params[w_type] = (A, B)
    return params


def lora_apply(params, x, w_type="q", **kwargs):
    A, B = params[w_type]
    # PyTorch Linear: y = x @ W.T -> pass pre-transposed weights.
    return lora_adapter_forward(x, A.T, B.T, **kwargs)


if __name__ == "__main__":
    dim, r = 256, 4
    batch, seq = 2, 8  # flattened rows M = 16

    key = jax.random.PRNGKey(0)
    kx, kp, kb = jax.random.split(key, 3)
    x = jax.random.normal(kx, (batch, seq, dim), dtype=jnp.float32)
    params = make_lora_params(kp, dim=dim, r=r)

    ok = True

    # 1) Module-faithful init (second Linear zero-init) -> output is exactly 0.
    y0 = jax.block_until_ready(lora_apply(params, x, "q"))
    ok &= (y0.shape == x.shape) and (y0.dtype == x.dtype)
    ok &= bool(jnp.all(y0 == 0.0))

    # 2) Non-trivial second weight to exercise both matmuls, all four adapters.
    for i, w_type in enumerate(("q", "k", "v", "o")):
        A = params[w_type][0]
        B = jax.random.normal(jax.random.fold_in(kb, i), (dim, r), jnp.float32) * 0.02
        y = jax.block_until_ready(lora_adapter_forward(x, A.T, B.T))
        y_ref = (x @ A.T) @ B.T
        ok &= (y.shape == x.shape) and (y.dtype == x.dtype)
        ok &= bool(jnp.allclose(y, y_ref, atol=1e-4, rtol=1e-4))

    # 3) Non-divisible row count + multi-step grid (partial final block path).
    x_odd = jax.random.normal(jax.random.fold_in(kx, 1), (3, 5, dim), jnp.float32)  # M = 15
    A = params["q"][0]
    B = jax.random.normal(kb, (dim, r), jnp.float32) * 0.02
    y_odd = jax.block_until_ready(lora_adapter_forward(x_odd, A.T, B.T, tm=8))
    ok &= bool(jnp.allclose(y_odd, (x_odd @ A.T) @ B.T, atol=1e-4, rtol=1e-4))
    ok &= (y_odd.shape == x_odd.shape)

    # 4) bf16 streaming path (halves HBM traffic; f32 accumulation).
    xb = x.astype(jnp.bfloat16)
    yb = jax.block_until_ready(lora_adapter_forward(xb, A.T, B.T))
    yb_ref = (xb.astype(jnp.float32) @ A.T) @ B.T
    ok &= (yb.dtype == jnp.bfloat16) and (yb.shape == x.shape)
    ok &= bool(jnp.allclose(yb.astype(jnp.float32), yb_ref, atol=5e-2, rtol=5e-2))

    print("KERNEL_OK" if ok else "KERNEL_MISMATCH")
</pallas_src>

<mosaic_0001>
module attributes {stable_mosaic.version = 11 : i64} {
  func.func @_lora_kernel(%arg0: i32, %arg1: memref<16x256xf32, #tpu.memory_space<vmem>>, %arg2: memref<256x8xf32, #tpu.memory_space<vmem>>, %arg3: memref<8x256xf32, #tpu.memory_space<vmem>>, %arg4: memref<16x256xf32, #tpu.memory_space<vmem>>) attributes {dimension_semantics = [#tpu.dimension_semantics<parallel>], iteration_bounds = array<i64: 1>, scalar_prefetch = 0 : i64, scratch_operands = 0 : i64, tpu.core_type = #tpu.core_type<tc>, window_params = [{transform_indices = @transform_0, window_bounds = array<i64: 16, 256>}, {pipeline_mode = #tpu.pipeline_mode<synchronous>, transform_indices = @transform_1, window_bounds = array<i64: 256, 8>}, {pipeline_mode = #tpu.pipeline_mode<synchronous>, transform_indices = @transform_2, window_bounds = array<i64: 8, 256>}, {transform_indices = @transform_3, window_bounds = array<i64: 16, 256>}]} {
    %c0 = arith.constant 0 : index
    %c0_0 = arith.constant 0 : index
    %0 = vector.load %arg1[%c0, %c0_0] : memref<16x256xf32, #tpu.memory_space<vmem>>, vector<16x256xf32>
    %c0_1 = arith.constant 0 : index
    %c0_2 = arith.constant 0 : index
    %1 = vector.load %arg2[%c0_1, %c0_2] : memref<256x8xf32, #tpu.memory_space<vmem>>, vector<256x8xf32>
    %cst = arith.constant dense<0.000000e+00> : vector<16x8xf32>
    %2 = tpu.matmul %0, %1, %cst {dimension_numbers = #tpu.dot_dimension_numbers<[1], [0], [0], [1], [0, 0, 1, 1], [], []>} : vector<16x256xf32>, vector<256x8xf32>, vector<16x8xf32> -> vector<16x8xf32>
    %c0_3 = arith.constant 0 : index
    %c0_4 = arith.constant 0 : index
    %3 = vector.load %arg3[%c0_3, %c0_4] : memref<8x256xf32, #tpu.memory_space<vmem>>, vector<8x256xf32>
    %cst_5 = arith.constant dense<0.000000e+00> : vector<16x256xf32>
    %4 = tpu.matmul %2, %3, %cst_5 {dimension_numbers = #tpu.dot_dimension_numbers<[1], [0], [0], [1], [0, 0, 1, 1], [], []>} : vector<16x8xf32>, vector<8x256xf32>, vector<16x256xf32> -> vector<16x256xf32>
    %c0_6 = arith.constant 0 : index
    %c0_7 = arith.constant 0 : index
    %5 = vector.load %arg4[%c0_6, %c0_7] : memref<16x256xf32, #tpu.memory_space<vmem>>, vector<16x256xf32>
    tpu.vector_store %arg4[%c0_6, %c0_7], %4 {strides = array<i32>} : memref<16x256xf32, #tpu.memory_space<vmem>>, vector<16x256xf32>,
    return
  }
  func.func @transform_0(%arg0: i32) -> (i32, i32) {
    %c0_i32 = arith.constant 0 : i32
    %c0_i32_0 = arith.constant 0 : i32
    return %arg0, %c0_i32 : i32, i32
  }
  func.func @transform_1(%arg0: i32) -> (i32, i32) {
    %c0_i32 = arith.constant 0 : i32
    %c0_i32_0 = arith.constant 0 : i32
    %c0_i32_1 = arith.constant 0 : i32
    return %c0_i32, %c0_i32_0 : i32, i32
  }
  func.func @transform_2(%arg0: i32) -> (i32, i32) {
    %c0_i32 = arith.constant 0 : i32
    %c0_i32_0 = arith.constant 0 : i32
    %c0_i32_1 = arith.constant 0 : i32
    return %c0_i32, %c0_i32_0 : i32, i32
  }
  func.func @transform_3(%arg0: i32) -> (i32, i32) {
    %c0_i32 = arith.constant 0 : i32
    %c0_i32_0 = arith.constant 0 : i32
    return %arg0, %c0_i32 : i32, i32
  }
}

</mosaic_0001>

<bundles_post_ra>
// kernel: lora_adapter_forward.1
= control target key start
LH: loop header
LB: loop body
LE: loop exit
PB: predicated region body
PF: predicated region fallthrough
CT: control target
= control target key end

     0   :  { %s482_s0 = inlined_call_operand.vmem [shape: f32[16,256], index: 0, kind: input, shape index: {}]   ;;  %s483_s1 = inlined_call_operand.vmem [shape: f32[256,8], index: 1, kind: input, shape index: {}]   ;;  %s484_s2 = inlined_call_operand.vmem [shape: f32[8,256], index: 2, kind: input, shape index: {}]   ;;  %s485_s3 = inlined_call_operand.hbm [shape: f32[16,256], index: 3, kind: output, shape index: {}]  }
   0x1   :  { %v35_v0 = vld [vmem:[%s483_s1 + $0x80] sm:$0xff]  ;;  %v36_v1 = vld [vmem:[%s483_s1 + $0x88] sm:$0xff]  ;;  %v37_v5 = vld [vmem:[%s483_s1 + $0x90] sm:$0xff] }
   0x2   :  { %v19_v2 = vld [vmem:[%s483_s1] sm:$0xff]  ;;  %v272_v3 = vpack.c.bf16 %v36_v1, %v35_v0  ;;  %v20_v4 = vld [vmem:[%s483_s1 + $0x8] sm:$0xff]  ;;  %v38_v6 = vld [vmem:[%s483_s1 + $0x98] sm:$0xff] }
   0x3   :  { %v274_v7 = vpack.c.bf16 %v20_v4, %v19_v2  ;;  %v276_v8 = vpack.c.bf16 %v38_v6, %v37_v5  ;;  %v21_v9 = vld [vmem:[%s483_s1 + $0x10] sm:$0xff]  ;;  %v22_v10 = vld [vmem:[%s483_s1 + $0x18] sm:$0xff]  ;;  %v39_v11 = vld [vmem:[%s483_s1 + $0xa0] sm:$0xff] }
   0x4   :  { %273 = vmatprep.subr.bf16.mxu0 %v272_v3  ;;  %v40_v12 = vld [vmem:[%s483_s1 + $0xa8] sm:$0xff]  ;;  %v278_v13 = vpack.c.bf16 %v22_v10, %v21_v9  ;;  %v23_v15 = vld [vmem:[%s483_s1 + $0x20] sm:$0xff]  ;;  %v41_v17 = vld [vmem:[%s483_s1 + $0xb0] sm:$0xff] }
   0x5   :  { %275 = vmatpush3.bf16.msra.mxu0 %v274_v7  ;;  %v280_v14 = vpack.c.bf16 %v40_v12, %v39_v11  ;;  %v24_v16 = vld [vmem:[%s483_s1 + $0x28] sm:$0xff]  ;;  %v42_v18 = vld [vmem:[%s483_s1 + $0xb8] sm:$0xff]  ;;  %v25_v21 = vld [vmem:[%s483_s1 + $0x30] sm:$0xff] }
   0x6   :  { %277 = vmatprep.subr.bf16.mxu0 %v276_v8  ;;  %v282_v19 = vpack.c.bf16 %v24_v16, %v23_v15  ;;  %v284_v20 = vpack.c.bf16 %v42_v18, %v41_v17  ;;  %v26_v22 = vld [vmem:[%s483_s1 + $0x38] sm:$0xff]  ;;  %v43_v23 = vld [vmem:[%s483_s1 + $0xc0] sm:$0xff]  ;;  %v44_v24 = vld [vmem:[%s483_s1 + $0xc8] sm:$0xff] }
   0x7   :  { %v16_v25 = vld [vmem:[%s482_s0 + $0x8] sm:$0xff]  ;;  %v286_v26 = vpack.c.bf16 %v26_v22, %v25_v21 }
   0x8   :  { %115 = vmatprep.mubr.f32.mxu0 %v16_v25 }
   0x9   :  { %279 = vmatpush3.bf16.msra.mxu0 %v278_v13 }
   0xa   :  { %281 = vmatprep.subr.bf16.mxu0 %v280_v14 }
   0xd   :  { %283 = vmatpush3.bf16.msra.mxu0 %v282_v19 }
   0xe   :  { %8 = vsyncpa [#allocation3], 0  ;;  %285 = vmatprep.subr.bf16.mxu0 %v284_v20  ;;  %v288_v27 = vpack.c.bf16 %v44_v24, %v43_v23  ;;  %v27_v28 = vld [vmem:[%s483_s1 + $0x40] sm:$0xff]  ;;  %v28_v29 = vld [vmem:[%s483_s1 + $0x48] sm:$0xff]  ;;  %v332_v54 = vmov 0.0   ;;  %vm128_vm0 = vcmask 64512  }
   0xf   :  { %v45_v30 = vld [vmem:[%s483_s1 + $0xd0] sm:$0xff]  ;;  %v46_v31 = vld [vmem:[%s483_s1 + $0xd8] sm:$0xff]  ;;  %v290_v32 = vpack.c.bf16 %v28_v29, %v27_v28  ;;  %v47_v36 = vld [vmem:[%s483_s1 + $0xe0] sm:$0xff]  ;;  %199 = vmatprep.mubr.f32.mxu1 %v332_v54 }
  0x10   :  { %v292_v33 = vpack.c.bf16 %v46_v31, %v45_v30  ;;  %v29_v34 = vld [vmem:[%s483_s1 + $0x50] sm:$0xff]  ;;  %v30_v35 = vld [vmem:[%s483_s1 + $0x58] sm:$0xff]  ;;  %v48_v37 = vld [vmem:[%s483_s1 + $0xe8] sm:$0xff] }
  0x11   :  { %287 = vmatpush3.bf16.msra.mxu0 %v286_v26  ;;  %v294_v38 = vpack.c.bf16 %v30_v35, %v29_v34  ;;  %v296_v39 = vpack.c.bf16 %v48_v37, %v47_v36  ;;  %v31_v40 = vld [vmem:[%s483_s1 + $0x60] sm:$0xff]  ;;  %v32_v41 = vld [vmem:[%s483_s1 + $0x68] sm:$0xff]  ;;  %v49_v42 = vld [vmem:[%s483_s1 + $0xf0] sm:$0xff] }
  0x12   :  { %289 = vmatprep.subr.bf16.mxu0 %v288_v27  ;;  %v50_v43 = vld [vmem:[%s483_s1 + $0xf8] sm:$0xff]  ;;  %v298_v44 = vpack.c.bf16 %v32_v41, %v31_v40  ;;  %v33_v46 = vld [vmem:[%s483_s1 + $0x70] sm:$0xff]  ;;  %v15_v49 = vld [vmem:[%s482_s0] sm:$0xff] }
  0x13   :  { %v300_v45 = vpack.c.bf16 %v50_v43, %v49_v42  ;;  %v34_v47 = vld [vmem:[%s483_s1 + $0x78] sm:$0xff]  ;;  %v17_v51 = vld [vmem:[%s482_s0 + $0x10] sm:$0xff]  ;;  %v127_v52 = vld [vmem:[%s484_s2 + $0x8] sm:$0xff] }
  0x14   :  { %v302_v48 = vpack.c.bf16 %v34_v47, %v33_v46  ;;  %v18_v50 = vld [vmem:[%s482_s0 + $0x18] sm:$0xff]  ;;  %135 = vmatprep.subr.mxu1 %v127_v52  ;;  %v126_v53 = vld [vmem:[%s484_s2] sm:$0xff]  ;;  %s333_s0 = smov [#allocation2]  }
  0x15   :  { %291 = vmatpush3.bf16.msra.mxu0 %v290_v32  ;;  %136 = vmatpush1.msra.mxu1 %v126_v53  ;;  %s221_s6 = sshll.u32 %s333_s0, 4  ;;  %s222_s6 = int_to_ptr.vmem [resolvable:$true] %s221_s6 }
  0x16   :  { %293 = vmatprep.subr.bf16.mxu0 %v292_v33  ;;  %s308_s2 = scalar_lea.vmem %s222_s6, 512  ;;  %p313_p1 = scmp.lt.s32.totalorder %s222_s6, %s222_s6 }
  0x17   :  { %p309_p0 = scmp.ne.s32.totalorder %s222_s6, %s308_s2  ;;  %p314_p2 = scmp.lt.s32.totalorder %s308_s2, %s308_s2 }
  0x19   :  { %295 = vmatpush3.bf16.msra.mxu0 %v294_v38  ;;  %p315_p3 = por %p314_p2, %p313_p1 }
  0x1a   :  { %297 = vmatprep.subr.bf16.mxu0 %v296_v39 }
  0x1b   :  { %p316_p4 = pnand %p315_p3, %p309_p0 }
  0x1d   :  { %299 = vmatpush3.bf16.msra.mxu0 %v298_v44 }
  0x1e   :  { %301 = vmatprep.subr.bf16.mxu0 %v300_v45 }
  0x21   :  { %303 = vmatpush3.bf16.msra.mxu0 %v302_v48 }
  0x24   :  { %116 = vmatmul.mubr.f32.vlgmr.msra.gmra.mrb[0].mxu0 %v15_v49 }
  0x25   :  { %120 = vmatprep.mubr.f32.mxu0 %v18_v50 }
  0x28   :  { %121 = vmatmul.mubr.f32.gmra.mrb[2].mxu0 %v17_v51 }
  0xf7   :  { %v266_v55 = vpop.f32.mrb[0].mxu0 }
  0xf8   :  { %v267_v56 = vpop.f32.mrb[1].mxu0 }
  0xf9   :  { %v268_v57 = vadd.f32 %v267_v56, %v266_v55 }
  0xfb   :  { %v269_v58 = vpop.f32.mrb[2].mxu0  ;;  %232 = vmatmul.mubr.msk.f32.vlgmr.msra.gmra.mrb[0].mxu1 %vm128_vm0, %v268_v57 }
  0xfc   :  { %v270_v59 = vpop.f32.mrb[3].mxu0  ;;  %205 = vmatprep.mubr.f32.mxu1 %v332_v54 }
  0xfd   :  { %v271_v60 = vadd.f32 %v270_v59, %v269_v58 }
  0xff   :  { %233 = vmatmul.mubr.msk.f32.gmra.mrb[2].mxu1 %vm128_vm0, %v271_v60 }
 0x1ce   :  { %v201_v61 = vpop.f32.mrb[0].mxu1 }
 0x1cf   :  { %212 = vst [vmem:[#allocation2] sm:$0xff] %v201_v61  ;;  %v203_v62 = vpop.f32.mrb[1].mxu1 }
 0x1d0   :  { %213 = vst [vmem:[#allocation2 + $0x8] sm:$0xff] %v203_v62 }
 0x1d2   :  { %v207_v63 = vpop.f32.mrb[2].mxu1 }
 0x1d3   :  { %214 = vst [vmem:[#allocation2 + $0x10] sm:$0xff] %v207_v63  ;;  %v209_v0 = vpop.f32.mrb[3].mxu1 }
 0x1d4   :  { %215 = vst [vmem:[#allocation2 + $0x18] sm:$0xff] %v209_v0 }
 0x1d5   :  { %319 = shalt.err (!%p316_p4)
}
 0x1d6   :  { %s320_s9 = scalar_lea.hbm %s485_s3, 512 }
 0x1d7   :  { %p321_p5 = scmp.ne.s32.totalorder %s485_s3, %s320_s9  ;;  %p324_p6 = scmp.lt.u32.totalorder %s320_s9, %s485_s3 }
 0x1d9   :  { %p326_p7 = pnand %p324_p6, %p321_p5 }
 0x1db   :  { %329 = shalt.err (!%p326_p7)
}
 0x1dc   :  { %s334_s14 = smov 256   ;;  %s335_s15 = smov 16  }
 0x1dd   :  { %227 = dma.vmem_to_hbm [thread:$0]  %s222_s6, 512, %s485_s3, [#allocation3], %s334_s14, %s334_s14, %s335_s15  }
 0x1de   :  { %330 = dma.done.wait [#allocation3], 512  }
 0x1df   :  { %331 = vsyncadd [#allocation3], 4294966784 }
 0x1e0   :  { %231 = vsyncpa [#allocation3], 1 }

</bundles_post_ra>
